<compile_context>
chip_gen: v5e
topology: v5e:2x2
jax: 0.10.0
libtpu: 0.0.40
codegen_flags: <defaults>
</compile_context>

<pallas_src>
import functools

import jax
import jax.numpy as jnp
import numpy as np
from jax.experimental import pallas as pl
from jax.experimental.pallas import tpu as pltpu


def text_sa_kernel(local_ref, gw_ref, wl_ref, bl_ref, bc_ref, out_ref, *, t_valid):
    bt, Tp, D = local_ref.shape
    local_bf16 = local_ref[...]                               # (bt, Tp, D) bf16

    # embedding_local: Linear -> Tanh -> Dropout(identity).
    # Flatten batch*token rows to fill the MXU M dimension; bf16 operands,
    # f32 accumulation.  Tp is a multiple of 16, so both reshapes are
    # layout-preserving (no relayout copies).
    x = local_bf16.reshape(bt * Tp, D)
    l_emb = jnp.tanh(
        jnp.dot(x, wl_ref[...], preferred_element_type=jnp.float32)
        + bl_ref[...])                                        # (bt*Tp, D) f32
    l_emb = l_emb.reshape(bt, Tp, D)

    # Logits of the D->1 projection with the D->1 weight pre-folded into the
    # global branch (gw = g_emb * wc): lane reduction instead of an N=1 matmul.
    logits = (jnp.sum(l_emb * gw_ref[...], axis=-1, keepdims=True)
              + bc_ref[0, 0])                                 # (bt, Tp, 1) f32

    # Mask padded tokens so they get zero attention weight.
    if Tp != t_valid:
        tok = jax.lax.broadcasted_iota(jnp.int32, (bt, Tp, 1), 1)
        logits = jnp.where(tok < t_valid, logits, -jnp.inf)

    # softmax over the token axis (torch dim=1).
    m = jnp.max(logits, axis=1, keepdims=True)
    e = jnp.exp(logits - m)
    denom = jnp.sum(e, axis=1, keepdims=True)
    w = e * pl.reciprocal(denom, approx=True)                 # (bt, Tp, 1)

    # new_global[b] = sum_t w[b, t] * local[b, t]  (f32 accumulation).
    local_f32 = local_bf16.astype(jnp.float32)
    out_ref[...] = jnp.sum(w * local_f32, axis=1, keepdims=True)   # (bt, 1, D)


def _vmem_capacity_bytes():
    try:
        return int(pltpu.get_tpu_info().vmem_capacity_bytes)
    except Exception:
        return 64 * 1024 * 1024   # conservative default (v7x per-TC VMEM)


def _choose_block_b(B, T_pad, D):
    """Largest divisor of B whose bf16 local tile fits a per-generation VMEM
    budget, with M = block_b*T_pad in a sane range, and grid >= 2 when B > 1
    (so v7x's two TensorCores both get work via the 'parallel' grid axis)."""
    if _vmem_capacity_bytes() >= 100 * 1024 * 1024:
        budget_bytes, max_rows = 8 * 1024 * 1024, 2048     # v5e / v6e (128 MiB)
    else:
        budget_bytes, max_rows = 4 * 1024 * 1024, 1024     # v7x (64 MiB per TC)
    best = 1
    for cand in range(1, B + 1):
        if B % cand:
            continue
        if B > 1 and B // cand < 2:
            continue
        if cand * T_pad <= max_rows and cand * T_pad * D * 2 <= budget_bytes:
            best = cand
    return best


def text_sa(local, raw_global, params, *, block_b=None):
    B, T, D = local.shape
    wl, bl, wg, bg, wc, bc = params

    # Hoisted global branch: one efficient (B, D) @ (D, D) matmul, then fold
    # the D->1 weight in.  Shaped (B, 1, D) so the BlockSpec trailing dims are
    # full-extent for any block_b.
    g_emb = jnp.tanh(raw_global.astype(jnp.float32) @ wg + bg)        # (B, D)
    gw = (g_emb * wc)[:, None, :]                                     # (B, 1, D)

    # Dominant HBM stream in bf16; pad T to a multiple of 16 so in-kernel
    # reshapes are layout-preserving (padded tokens are masked in the kernel).
    T_pad = ((T + 15) // 16) * 16
    local_bf16 = local.astype(jnp.bfloat16)
    if T_pad != T:
        local_bf16 = jnp.pad(local_bf16, ((0, 0), (0, T_pad - T), (0, 0)))

    if block_b is None:
        block_b = _choose_block_b(B, T_pad, D)
    assert B % block_b == 0
    grid = (B // block_b,)

    # bf16 weight for the local-branch MXU matmul (halves resident weight VMEM).
    wl_bf16 = wl.astype(jnp.bfloat16)
    bl_f32 = bl.astype(jnp.float32)
    bc_f32 = bc.astype(jnp.float32)

    vmem_limit = int(min(_vmem_capacity_bytes() // 2, 64 * 1024 * 1024))

    cost = pl.CostEstimate(
        flops=int(2 * B * T_pad * D * D),
        transcendentals=int(B * T_pad * (D + 1)),
        bytes_accessed=int(B * T_pad * D * 2      # local (bf16)
                           + D * D * 2            # wl (bf16)
                           + B * D * 4            # gw
                           + D * 4                # bl
                           + B * D * 4))          # output

    # TODO(synk): for very large D (>= ~2048 bf16 weight) add a K-reduction
    # grid axis over wl ("arbitrary", f32 scratch accumulator, pl.when
    # init/finalize before the tanh) so the (D, D) weight need not be fully
    # resident on 64 MiB-VMEM v7x.
    # TODO(synk): single-buffer the constant-index wl/bl/gw specs
    # (pipeline_mode=pl.Buffered(1)) once confirmed to lower cleanly; saves
    # ~half the resident weight VMEM on v7x.
    out3 = pl.pallas_call(
        functools.partial(text_sa_kernel, t_valid=T),
        out_shape=jax.ShapeDtypeStruct((B, 1, D), jnp.float32),
        grid=grid,
        in_specs=[
            pl.BlockSpec((block_b, T_pad, D), lambda b: (b, 0, 0)),   # local (bf16)
            pl.BlockSpec((block_b, 1, D), lambda b: (b, 0, 0)),       # gw = g_emb*wc
            pl.BlockSpec((D, D), lambda b: (0, 0)),                   # W_local (bf16)
            pl.BlockSpec((1, D), lambda b: (0, 0)),                   # b_local
            pl.BlockSpec(memory_space=pltpu.MemorySpace.SMEM),        # b_common scalar
        ],
        out_specs=pl.BlockSpec((block_b, 1, D), lambda b: (b, 0, 0)),
        compiler_params=pltpu.CompilerParams(
            dimension_semantics=("parallel",),
            vmem_limit_bytes=vmem_limit,
        ),
        cost_estimate=cost,
    )(local_bf16, gw, wl_bf16, bl_f32, bc_f32)
    return out3[:, 0, :]


def init_params(key, embed_dim):
    """Mimics TextSA.init_weights: uniform(-r, r), r = sqrt(6)/sqrt(fan_in+fan_out), bias 0."""
    k1, k2, k3 = jax.random.split(key, 3)
    r_dd = np.sqrt(6.0) / np.sqrt(embed_dim + embed_dim)
    r_d1 = np.sqrt(6.0) / np.sqrt(embed_dim + 1)
    wl = jax.random.uniform(k1, (embed_dim, embed_dim), jnp.float32, -r_dd, r_dd)
    bl = jnp.zeros((1, embed_dim), jnp.float32)
    wg = jax.random.uniform(k2, (embed_dim, embed_dim), jnp.float32, -r_dd, r_dd)
    bg = jnp.zeros((1, embed_dim), jnp.float32)
    wc = jax.random.uniform(k3, (1, embed_dim), jnp.float32, -r_d1, r_d1)
    bc = jnp.zeros((1, 1), jnp.float32)
    return (wl, bl, wg, bg, wc, bc)


def text_sa_reference_f32(local, raw_global, params):
    """Pure-JAX f32 reference of the TextSA forward (inference mode)."""
    wl, bl, wg, bg, wc, bc = params
    l_emb = jnp.tanh(local @ wl + bl)
    g_emb = jnp.tanh(raw_global @ wg + bg)
    common = l_emb * g_emb[:, None, :]
    logits = jnp.sum(common * wc[None, :, :], axis=-1) + bc[0, 0]
    w = jax.nn.softmax(logits, axis=1)
    return jnp.sum(w[:, :, None] * local, axis=1)


def text_sa_reference_bf16(local, raw_global, params):
    """Reference mirroring the kernel's bf16 local stream / f32 accumulation."""
    wl, bl, wg, bg, wc, bc = params
    local_bf = local.astype(jnp.bfloat16)
    l_emb = jnp.tanh(
        jnp.dot(local_bf, wl.astype(jnp.bfloat16),
                preferred_element_type=jnp.float32) + bl)
    g_emb = jnp.tanh(raw_global @ wg + bg)
    gw = g_emb * wc                                   # (B, D)
    logits = jnp.sum(l_emb * gw[:, None, :], axis=-1) + bc[0, 0]
    w = jax.nn.softmax(logits, axis=1)
    return jnp.sum(w[:, :, None] * local_bf.astype(jnp.float32), axis=1)


if __name__ == "__main__":
    # Small shapes consistent with the module (docstring uses T=15, D=1024).
    B, T, D = 2, 8, 128
    key = jax.random.PRNGKey(0)
    kx, kg, kp = jax.random.split(key, 3)
    local = jax.random.normal(kx, (B, T, D), jnp.float32)
    raw_global = jnp.mean(local, axis=1) + 0.1 * jax.random.normal(kg, (B, D), jnp.float32)
    params = init_params(kp, D)

    out = jax.block_until_ready(text_sa(local, raw_global, params))
    assert out.shape == (B, D)

    # Tight check against a reference that matches the kernel's bf16 streams.
    ref_bf16 = text_sa_reference_bf16(local, raw_global, params)
    np.testing.assert_allclose(np.asarray(out), np.asarray(ref_bf16), rtol=5e-3, atol=5e-3)

    # Coarse sanity check against the full-f32 semantics of the module.
    ref_f32 = text_sa_reference_f32(local, raw_global, params)
    np.testing.assert_allclose(np.asarray(out), np.asarray(ref_f32), rtol=5e-2, atol=5e-2)

    print("KERNEL_OK")
</pallas_src>

<mosaic_0001>
module attributes {stable_mosaic.version = 11 : i64} {
  func.func @text_sa_kernel(%arg0: i32, %arg1: memref<1x16x128xbf16, #tpu.memory_space<vmem>>, %arg2: memref<1x1x128xf32, #tpu.memory_space<vmem>>, %arg3: memref<128x128xbf16, #tpu.memory_space<vmem>>, %arg4: memref<1x128xf32, #tpu.memory_space<vmem>>, %arg5: memref<1x1xf32, #tpu.memory_space<smem>>, %arg6: memref<1x1x128xf32, #tpu.memory_space<vmem>>) attributes {dimension_semantics = [#tpu.dimension_semantics<parallel>], iteration_bounds = array<i64: 2>, scalar_prefetch = 0 : i64, scratch_operands = 0 : i64, tpu.core_type = #tpu.core_type<tc>, window_params = [{transform_indices = @transform_0, window_bounds = array<i64: 1, 16, 128>}, {transform_indices = @transform_1, window_bounds = array<i64: 1, 1, 128>}, {pipeline_mode = #tpu.pipeline_mode<synchronous>, transform_indices = @transform_2, window_bounds = array<i64: 128, 128>}, {pipeline_mode = #tpu.pipeline_mode<synchronous>, transform_indices = @transform_3, window_bounds = array<i64: 1, 128>}, {transform_indices = @transform_4, window_bounds = array<i64: 1, 1>}, {transform_indices = @transform_5, window_bounds = array<i64: 1, 1, 128>}]} {
    %c0 = arith.constant 0 : index
    %c0_0 = arith.constant 0 : index
    %c0_1 = arith.constant 0 : index
    %0 = vector.load %arg1[%c0, %c0_0, %c0_1] : memref<1x16x128xbf16, #tpu.memory_space<vmem>>, vector<1x16x128xbf16>
    %1 = vector.shape_cast %0 : vector<1x16x128xbf16> to vector<16x128xbf16>
    %c0_2 = arith.constant 0 : index
    %c0_3 = arith.constant 0 : index
    %2 = vector.load %arg3[%c0_2, %c0_3] : memref<128x128xbf16, #tpu.memory_space<vmem>>, vector<128x128xbf16>
    %cst = arith.constant dense<0.000000e+00> : vector<16x128xf32>
    %3 = tpu.matmul %1, %2, %cst {dimension_numbers = #tpu.dot_dimension_numbers<[1], [0], [0], [1], [0, 0, 1, 1], [], []>} : vector<16x128xbf16>, vector<128x128xbf16>, vector<16x128xf32> -> vector<16x128xf32>
    %c0_4 = arith.constant 0 : index
    %c0_5 = arith.constant 0 : index
    %4 = vector.load %arg4[%c0_4, %c0_5] : memref<1x128xf32, #tpu.memory_space<vmem>>, vector<1x128xf32>
    %5 = vector.broadcast %4 : vector<1x128xf32> to vector<16x128xf32>
    %6 = arith.addf %3, %5 : vector<16x128xf32>
    %7 = math.tanh %6 : vector<16x128xf32>
    %8 = vector.shape_cast %7 : vector<16x128xf32> to vector<1x16x128xf32>
    %c0_6 = arith.constant 0 : index
    %c0_7 = arith.constant 0 : index
    %c0_8 = arith.constant 0 : index
    %9 = vector.load %arg2[%c0_6, %c0_7, %c0_8] : memref<1x1x128xf32, #tpu.memory_space<vmem>>, vector<1x1x128xf32>
    %10 = vector.broadcast %9 : vector<1x1x128xf32> to vector<1x16x128xf32>
    %11 = arith.mulf %8, %10 : vector<1x16x128xf32>
    %cst_9 = arith.constant dense<0.000000e+00> : vector<1x16xf32>
    %12 = vector.multi_reduction <add>, %11, %cst_9 [2] : vector<1x16x128xf32> to vector<1x16xf32>
    %13 = vector.shape_cast %12 : vector<1x16xf32> to vector<1x16x1xf32>
    %c0_10 = arith.constant 0 : index
    %c0_11 = arith.constant 0 : index
    %14 = memref.load %arg5[%c0_10, %c0_11] : memref<1x1xf32, #tpu.memory_space<smem>>
    %15 = vector.broadcast %14 : f32 to vector<1x16x1xf32>
    %16 = arith.addf %13, %15 : vector<1x16x1xf32>
    %17 = tpu.iota {dimensions = array<i32: 1>} : vector<1x16x1xi32>
    %c8_i32 = arith.constant 8 : i32
    %18 = vector.broadcast %c8_i32 : i32 to vector<1x16x1xi32>
    %19 = arith.cmpi slt, %17, %18 : vector<1x16x1xi32>
    %cst_12 = arith.constant 0xFF800000 : f32
    %20 = vector.broadcast %cst_12 : f32 to vector<1x16x1xf32>
    %21 = arith.select %19, %16, %20 : vector<1x16x1xi1>, vector<1x16x1xf32>
    %cst_13 = arith.constant dense<0xFF800000> : vector<1x1xf32>
    %22 = vector.multi_reduction <maximumf>, %21, %cst_13 [1] : vector<1x16x1xf32> to vector<1x1xf32>
    %23 = vector.shape_cast %22 : vector<1x1xf32> to vector<1x1x1xf32>
    %24 = vector.broadcast %23 : vector<1x1x1xf32> to vector<1x16x1xf32>
    %25 = arith.subf %21, %24 : vector<1x16x1xf32>
    %26 = math.exp %25 : vector<1x16x1xf32>
    %cst_14 = arith.constant dense<0.000000e+00> : vector<1x1xf32>
    %27 = vector.multi_reduction <add>, %26, %cst_14 [1] : vector<1x16x1xf32> to vector<1x1xf32>
    %28 = vector.shape_cast %27 : vector<1x1xf32> to vector<1x1x1xf32>
    %29 = tpu.reciprocal %28 {approx = true} : vector<1x1x1xf32> -> vector<1x1x1xf32>
    %30 = vector.broadcast %29 : vector<1x1x1xf32> to vector<1x16x1xf32>
    %31 = arith.mulf %26, %30 : vector<1x16x1xf32>
    %32 = arith.extf %0 : vector<1x16x128xbf16> to vector<1x16x128xf32>
    %33 = vector.broadcast %31 : vector<1x16x1xf32> to vector<1x16x128xf32>
    %34 = arith.mulf %33, %32 : vector<1x16x128xf32>
    %cst_15 = arith.constant dense<0.000000e+00> : vector<1x128xf32>
    %35 = vector.multi_reduction <add>, %34, %cst_15 [1] : vector<1x16x128xf32> to vector<1x128xf32>
    %36 = vector.shape_cast %35 : vector<1x128xf32> to vector<1x1x128xf32>
    %c0_16 = arith.constant 0 : index
    %c0_17 = arith.constant 0 : index
    %c0_18 = arith.constant 0 : index
    %37 = vector.load %arg6[%c0_16, %c0_17, %c0_18] : memref<1x1x128xf32, #tpu.memory_space<vmem>>, vector<1x1x128xf32>
    tpu.vector_store %arg6[%c0_16, %c0_17, %c0_18], %36 {strides = array<i32>} : memref<1x1x128xf32, #tpu.memory_space<vmem>>, vector<1x1x128xf32>,
    return
  }
  func.func @transform_0(%arg0: i32) -> (i32, i32, i32) {
    %c0_i32 = arith.constant 0 : i32
    %c0_i32_0 = arith.constant 0 : i32
    %c0_i32_1 = arith.constant 0 : i32
    return %arg0, %c0_i32, %c0_i32_0 : i32, i32, i32
  }
  func.func @transform_1(%arg0: i32) -> (i32, i32, i32) {
    %c0_i32 = arith.constant 0 : i32
    %c0_i32_0 = arith.constant 0 : i32
    %c0_i32_1 = arith.constant 0 : i32
    return %arg0, %c0_i32, %c0_i32_0 : i32, i32, i32
  }
  func.func @transform_2(%arg0: i32) -> (i32, i32) {
    %c0_i32 = arith.constant 0 : i32
    %c0_i32_0 = arith.constant 0 : i32
    %c0_i32_1 = arith.constant 0 : i32
    return %c0_i32, %c0_i32_0 : i32, i32
  }
  func.func @transform_3(%arg0: i32) -> (i32, i32) {
    %c0_i32 = arith.constant 0 : i32
    %c0_i32_0 = arith.constant 0 : i32
    %c0_i32_1 = arith.constant 0 : i32
    return %c0_i32, %c0_i32_0 : i32, i32
  }
  func.func @transform_4(%arg0: i32) -> (i32, i32) {
    %c0_i32 = arith.constant 0 : i32
    %c0_i32_0 = arith.constant 0 : i32
    %c0_i32_1 = arith.constant 0 : i32
    return %c0_i32, %c0_i32_0 : i32, i32
  }
  func.func @transform_5(%arg0: i32) -> (i32, i32, i32) {
    %c0_i32 = arith.constant 0 : i32
    %c0_i32_0 = arith.constant 0 : i32
    %c0_i32_1 = arith.constant 0 : i32
    return %arg0, %c0_i32, %c0_i32_0 : i32, i32, i32
  }
}

</mosaic_0001>

<bundles_post_ra>
// kernel: tpu_custom_call.1
= control target key start
LH: loop header
LB: loop body
LE: loop exit
PB: predicated region body
PF: predicated region fallthrough
CT: control target
= control target key end

     0   :  { %s974_s0 = inlined_call_operand.hbm [shape: bf16[2,16,128], index: 0, kind: input, shape index: {}]   ;;  %s975_s1 = inlined_call_operand.vmem [shape: f32[2,1,128], index: 1, kind: input, shape index: {}]   ;;  %s976_s2 = inlined_call_operand.hbm [shape: bf16[128,128], index: 2, kind: input, shape index: {}]   ;;  %s977_s3 = inlined_call_operand.vmem [shape: f32[1,128], index: 3, kind: input, shape index: {}]   ;;  %s978_s4 = inlined_call_operand.<no memory space> [shape: f32[1,1], index: 4, kind: input, shape index: {}]   ;;  %s979_s5 = inlined_call_operand.hbm [shape: f32[2,1,128], index: 5, kind: output, shape index: {}]  }
   0x1   :  { %10 = sst [smem:[#allocation2]] %s978_s4 }
   0x2   :  { %11 = vsyncpa [#allocation4], 0 }
   0x3   :  { %13 = vsyncpa [#allocation4 + $0x1], 0 }
   0x4   :  { %14 = vsyncpa [#allocation7], 0 }
   0x5   :  { %15 = vsyncpa [#allocation5], 0 }
   0x6   :  { %17 = vsyncpa [#allocation5 + $0x1], 0  ;;  %s817_s20 = smov 0   ;;  %s819_s21 = smov 0  }
   0x7   :  { %s821_s22 = smov 0   ;;  %s823_s23 = smov 0  }
   0x8 LB: > { %s838_s4 = sadd.s32 4294967295, %s779_s23   ;;  %s522_s24 = sadd.s32 4294967294, %s779_s23   ;;  %s779_s23 = sphi %s823_s23, %s989_s23   ;;  %s775_s22 = sphi %s821_s22, %s988_s22   ;;  %s771_s21 = sphi %s819_s21, %s987_s21   ;;  %s767_s20 = sphi %s817_s20, %s986_s20  }
   0x9   : > { %p43_p0 = scmp.ne.s32.totalorder %s771_s21, %s767_s20  ;;  %p44_p1 = scmp.eq.s32.totalorder %s838_s4, 0 }
   0xa   : > { %p156_p2 = scmp.eq.s32.totalorder %s838_s4, 1  ;;  %p162_p3 = scmp.eq.s32.totalorder %s522_s24, 1 }
   0xb   : > { %p847_p4 = por %p44_p1, %p43_p0  ;;  %p523_p5 = scmp.ge.s32.totalorder %s779_s23, 1 }
   0xc   : > { %p852_p6 = por %p162_p3, %p43_p0  ;;  %p169_p7 = scmp.lt.s32.totalorder %s779_s23, 3 }
   0xd   : > { %s180_s29 = sshll.u32 %s976_s2, 4  ;;  %s781_s6 = smov [#allocation6]   ;;  %s181_s29 = int_to_ptr.hbm [resolvable:$true] %s180_s29 }
   0xe   : > { %p860_p8 = pnand %p523_p5, %p169_p7  ;;  %s182_s7 = sshll.u32 %s781_s6, 4  ;;  %s183_s7 = int_to_ptr.vmem [resolvable:$true] %s182_s7 }
   0xf   : > { %s870_s8 = sadd.s32 1, %s779_s23   ;;  %s782_s9 = smov 64  }
  0x10   : > { %p588_p9 = pneg %p860_p8  ;;  %s783_s10 = smov 4  }
  0x11   : > { %s27_s11 = ssub.s32 %s779_s23, %s870_s8  ;;  %s30_s12 = sadd.s32 1, %s775_s22 }
  0x12   : > { %p589_p10 = pnand %p588_p9, %p44_p1  ;;  %p28_p12 = scmp.eq.s32.totalorder %s27_s11, 0 }
  0x13   : > { %p37_p13 = scmp.ne.s32.totalorder %s775_s22, %s771_s21  ;;  %p38_p0 = scmp.eq.s32.totalorder %s779_s23, 0 }
  0x14   : > { %591 = dma.hbm_to_vmem [thread:$0]  (!%p589_p10), %s181_s29, 1024, %s183_s7, [#allocation7], %s782_s9, %s782_s9, %s783_s10  }
  0x15   : > { %s882_s13 = scalar_select %p28_p12, %s775_s22, %s30_s12  }
  0x16   : > { %p886_p3 = por %p156_p2, %p37_p13  ;;  %p601_p5 = scmp.lt.s32.totalorder %s779_s23, 2 }
  0x17   : > { %s202_s15 = sand.u32 1, %s775_s22   ;;  %s570_s16 = sshll.u32 %s779_s23, 3 }
  0x18   : > { %p39_p7 = por %p38_p0, %p37_p13  ;;  %s526_s17 = sshll.u32 %s202_s15, 3 }
  0x19   : > { %s211_s24 = scalar_lea.hbm %s974_s0, %s570_s16  ;;  %s206_s28 = scalar_lea.vmem [#allocation3], %s526_s17 }
  0x1a   : > { %s212_s27 = sshll.u32 %s211_s24, 4  ;;  %s214_s29 = sshll.u32 %s206_s28, 4  ;;  %s213_s27 = int_to_ptr.hbm [resolvable:$true] %s212_s27  ;;  %s215_s29 = int_to_ptr.vmem [resolvable:$true] %s214_s29 }
  0x1b   : > { %p896_p9 = pnand %p601_p5, %p39_p7  ;;  %s203_s7 = scalar_lea.sflag [#allocation4], %s202_s15 }
  0x1c   : > { %s679_s11 = sshra.s32 %s213_s27, 4  ;;  %s686_s17 = scalar_lea.hbm %s974_s0, 16  ;;  %s680_s11 = int_to_ptr.hbm [resolvable:$true] %s679_s11 }
  0x1d   : > { %s681_s12 = scalar_lea.hbm %s680_s11, 8  ;;  %p683_p10 = pneg %p896_p9 }
  0x1e   : > { %p682_p2 = scmp.ne.s32.totalorder %s680_s11, %s681_s12  ;;  %p687_p0 = scmp.lt.s32.totalorder %s680_s11, %s974_s0 }
  0x1f   : > { %p688_p5 = scmp.lt.s32.totalorder %s686_s17, %s681_s12 }
  0x20   : > { %p684_p12 = pnand %p683_p10, %p682_p2 }
  0x21   : > { %p689_p7 = por %p688_p5, %p687_p0 }
  0x22   : > { %p685_p13 = pneg %p684_p12 }
  0x24   : > { %p690_p11 = pnand %p689_p7, %p685_p13 }
  0x26   : > { %693 = shalt.err (!%p690_p11)
}
  0x27   : > { %595 = dma.hbm_to_vmem [thread:$0]  (!%p896_p9), %s213_s27, 128, %s215_s29, %s203_s7, %s782_s9, %s782_s9, %s783_s10  }
  0x28   : > { %232 = sbr.rel (%p860_p8) target bundleno = 401 (0x191), region = 40  ;;  %s916_s15 = sand.u32 (!%p860_p8), 1, %s771_s21  }
  0x29   : > { %s530_s28 = sshll.u32 (!%p860_p8), %s916_s15, 3  ;;  %s235_s11 = scalar_lea.sflag (!%p860_p8), [#allocation4], %s916_s15 }
  0x2a   : > { %s920_s12 = scalar_lea.vmem (!%p860_p8), [#allocation3], %s530_s28 }
  0x2d   : > { %754 = dma.done.wait (%p847_p4), %s235_s11, 128  }
  0x2e   : > { %756 = vsyncadd (%p847_p4), %s235_s11, 4294967168 }
  0x2f   : > { %758 = dma.done.wait (%p44_p1), [#allocation7], 1024  }
  0x30   : > { %760 = vsyncadd (%p44_p1), [#allocation7], 4294966272  ;;  %v579_v0 = vld [vmem:[#allocation6 + $0x38] sm:$0xff]  ;;  %v578_v1 = vld [vmem:[#allocation6 + $0x30] sm:$0xff]  ;;  %p273_p1 = scmp.lt.s32.totalorder %s838_s4, 1  ;;  %s378_s6 = sld [smem:[#allocation2]] }
  0x31   : > { %352 = vmatpush.bf16.msra.mxu0 %v579_v0  ;;  %v577_v2 = vld [vmem:[#allocation6 + $0x28] sm:$0xff]  ;;  %v576_v3 = vld [vmem:[#allocation6 + $0x20] sm:$0xff]  ;;  %v575_v4 = vld [vmem:[#allocation6 + $0x18] sm:$0xff]  ;;  %s433_s18 = scalar_lea.hbm %s979_s5, %s838_s4  ;;  %s272_s17 = scalar_lea.vmem [#allocation8], %s916_s15 }
  0x32   : > { %v574_v5 = vld [vmem:[#allocation6 + $0x10] sm:$0xff]  ;;  %v573_v6 = vld [vmem:[#allocation6 + $0x8] sm:$0xff]  ;;  %v572_v7 = vld [vmem:[#allocation6] sm:$0xff]  ;;  %s274_s25 = scalar_select %p273_p1, %s838_s4, 1 }
  0x33   : > { %v571_v8 = vld [vmem:[%s920_s12] sm:$0xff]  ;;  %s435_s19 = sshll.u32 %s272_s17, 4  ;;  %s437_s24 = sshll.u32 %s433_s18, 4  ;;  %s436_s19 = int_to_ptr.vmem [resolvable:$true] %s435_s19  ;;  %s438_s24 = int_to_ptr.hbm [resolvable:$true] %s437_s24 }
  0x34   : > { %s275_s10 = scalar_lea.vmem %s975_s1, %s274_s25  ;;  %v639_v9 = vld [vmem:[%s977_s3] ss:$0 sm:$0xff]  ;;  %s425_s28 = scalar_lea.sflag [#allocation5], %s916_s15 }
  0x35   : > { %353 = vmatpush.bf16.msra.mxu0 %v578_v1  ;;  %v640_v12 = vld [vmem:[%s275_s10] ss:$0 sm:$0xff]  ;;  %s723_s11 = sshra.s32 %s438_s24, 4  ;;  %s729_s4 = scalar_lea.hbm %s979_s5, 2  ;;  %s724_s11 = int_to_ptr.hbm [resolvable:$true] %s723_s11 }
  0x36   : > { %v379_v16 = vstv %s378_s6  ;;  %v276_v38 = vld [vmem:[%s920_s12] sm:$0xff]   ;;  %s725_s12 = scalar_lea.hbm %s724_s11, 1  ;;  %p730_p9 = scmp.lt.s32.totalorder %s724_s11, %s979_s5 }
  0x37   : > { %v412_v39 = vunpack.c.l.bf16 %v276_v38  ;;  %v413_v40 = vunpack.c.h.bf16 %v276_v38  ;;  %p726_p4 = scmp.ne.s32.totalorder %s724_s11, %s725_s12  ;;  %p731_p2 = scmp.lt.s32.totalorder %s729_s4, %s725_s12 }
  0x39   : > { %354 = vmatpush.bf16.msra.mxu0 %v577_v2  ;;  %p727_p8 = pnand %p726_p4, %p886_p3  ;;  %p732_p10 = por %p731_p2, %p730_p9 }
  0x3b   : > { %p728_p11 = pneg %p727_p8 }
  0x3d   : > { %355 = vmatpush.bf16.msra.mxu0 %v576_v3  ;;  %p733_p12 = pnand %p732_p10, %p728_p11 }
  0x41   : > { %356 = vmatpush.bf16.msra.mxu0 %v575_v4 }
  0x45   : > { %357 = vmatpush.bf16.msra.mxu0 %v574_v5 }
  0x49   : > { %358 = vmatpush.bf16.msra.mxu0 %v573_v6 }
  0x4d   : > { %359 = vmatpush.bf16.msra.mxu0 %v572_v7 }
  0x50   : > { %360 = vmatmul.bf16.vlgmr.msra.gmra.mxu0 %v571_v8 }
  0xcd   : > { %v361_v10 = vpop.f32.mrf.mxu0 }
  0xce   : > { %v362_v11 = vadd.f32 %v639_v9, %v361_v10 }
  0xd0   : > { %641 = vtanh.f32 %v362_v11 }
  0xd5   : > { %v363_v13 = vpop.f32.mrf.mxu0 }
  0xd6   : > { %v642_v14 = vpop.eup %641 }
  0xd7   : > { %v372_v15 = vmul.f32 %v642_v14, %v640_v12 }
  0xd9   : > { %374 = vadd.xlane.f32.xlu0 %v372_v15 }
 0x14c   : > { %v375_v17 = vpop.xlane.xlu0 %374 }
 0x14d   : > { %v380_v18 = vadd.f32 %v379_v16, %v375_v17 }
 0x14f   : > { %v390_v19 = vrot.slane %v380_v18, 4 }
 0x151   : > { %v391_v20 = vmax.f32 %v380_v18, %v390_v19 }
 0x153   : > { %v392_v21 = vrot.slane %v391_v20, 2 }
 0x155   : > { %v393_v22 = vmax.f32 %v391_v20, %v392_v21 }
 0x157   : > { %v394_v23 = vrot.slane %v393_v22, 1 }
 0x159   : > { %v395_v24 = vmax.f32 %v393_v22, %v394_v23 }
 0x15b   : > { %v396_v25 = vsub.f32 %v380_v18, %v395_v24  ;;  %v397_v26 = vsub.f32 -inf, %v395_v24 }
 0x15d   : > { %v398_v27 = vmul.f32 1.442695, %v396_v25  ;;  %v400_v28 = vmul.f32 1.442695, %v397_v26 }
 0x15f   : > { %643 = vpow2.f32 %v398_v27 }
 0x160   : > { %645 = vpow2.f32 %v400_v28 }
 0x165   : > { %v644_v29 = vpop.eup %643 }
 0x166   : > { %v646_v30 = vpop.eup %645 }
 0x167   : > { %v402_v31 = vadd.f32 %v646_v30, %v644_v29 }
 0x169   : > { %v403_v32 = vrot.slane %v402_v31, 4 }
 0x16b   : > { %v404_v33 = vadd.f32 %v403_v32, %v402_v31 }
 0x16d   : > { %v405_v34 = vrot.slane %v404_v33, 2 }
 0x16f   : > { %v406_v35 = vadd.f32 %v405_v34, %v404_v33 }
 0x171   : > { %v407_v36 = vrot.slane %v406_v35, 1 }
 0x173   : > { %v408_v37 = vadd.f32 %v407_v36, %v406_v35 }
 0x175   : > { %647 = vrcp.f32 %v408_v37 }
 0x17b   : > { %v648_v41 = vpop.eup %647 }
 0x17c   : > { %v410_v42 = vmul.f32 %v648_v41, %v644_v29  ;;  %v411_v43 = vmul.f32 %v648_v41, %v646_v30 }
 0x17e   : > { %v414_v44 = vmul.f32 %v412_v39, %v410_v42  ;;  %v415_v45 = vmul.f32 %v413_v40, %v411_v43 }
 0x180   : > { %v416_v46 = vadd.f32 %v415_v45, %v414_v44 }
 0x182   : > { %v417_v47 = vrot.slane %v416_v46, 4 }
 0x184   : > { %v418_v48 = vadd.f32 %v417_v47, %v416_v46 }
 0x186   : > { %v419_v49 = vrot.slane %v418_v48, 2 }
 0x188   : > { %v420_v50 = vadd.f32 %v419_v49, %v418_v48 }
 0x18a   : > { %v421_v51 = vrot.slane %v420_v50, 1 }
 0x18c   : > { %v422_v52 = vadd.f32 %v421_v51, %v420_v50 }
 0x18e   : > { %423 = vst [vmem:[%s272_s17] sm:$0x1] %v422_v52 }
 0x18f   : > { %736 = shalt.err (!%p733_p12)
}
 0x190   : > { %586 = dma.vmem_to_hbm [thread:$0]  (%p886_p3), %s436_s19, 16, %s438_s24, %s425_s28  }
 0x191 PF: > { %s449_s15 = sand.u32 1, %s767_s20   ;;  %p985_p13 = scmp.ge.s32.totalorder %s779_s23, 2 }
 0x192   : > { %s450_s27 = scalar_lea.sflag [#allocation5], %s449_s15 }
 0x193   : > { %p597_p0 = pnand %p985_p13, %p852_p6 }
 0x195   : > { %p598_p5 = pneg %p597_p0 }
 0x197   : > { %762 = dma.done.wait (%p598_p5), %s450_s27, 16  }
 0x198   : > { %764 = vsyncadd (%p598_p5), %s450_s27, 4294967280  ;;  %p20_p7 = scmp.ge.s32.totalorder %s870_s8, 4   ;;  %s986_s20 = smov %s771_s21 }
 0x199   : > { %s987_s21 = smov %s775_s22  ;;  %s988_s22 = smov %s882_s13 }
 0x19a   : > { %s989_s23 = smov %s870_s8  ;;  %22 = sbr.rel (!%p20_p7) target bundleno = 8 (0x8), region = 92 }
 0x19f   :  { %455 = vsyncpa [#allocation4], 1 }
 0x1a0   :  { %457 = vsyncpa [#allocation4 + $0x1], 1 }
 0x1a1   :  { %458 = vsyncpa [#allocation7], 1 }
 0x1a2   :  { %459 = vsyncpa [#allocation5], 1 }
 0x1a3   :  { %461 = vsyncpa [#allocation5 + $0x1], 1 }

</bundles_post_ra>
